<compile_context>
chip_gen: v6e
topology: v6e:2x2x1
jax: 0.10.0
libtpu: 0.0.40
codegen_flags: <defaults>
</compile_context>

<pallas_src>
import functools

import jax
import jax.numpy as jnp
import numpy as np
from jax.experimental import pallas as pl
from jax.experimental.pallas import tpu as pltpu

BN_EPS = 1e-5  # PyTorch BatchNorm2d default


def conv_bn_relu_kernel(lhs_ref, w_ref, gamma_ref, beta_ref, o_ref, *, cout):
    """Single grid cell; whole (small) problem resident in VMEM.

    lhs_ref:   (N*OH, Kpad)      im2row-over-H activations, bf16, K zero-padded
    w_ref:     (Kpad, OW*Cout)   block-Toeplitz conv weight, bf16 (W padding folded)
    gamma_ref: (1, OW*Cout)      BN weight, tiled per-ow, f32
    beta_ref:  (1, OW*Cout)      BN bias, tiled per-ow, f32
    o_ref:     (N*OH, OW*Cout)   lane-dense output, f32
    """
    NOH = lhs_ref.shape[0]
    OWC = o_ref.shape[1]
    ow = OWC // cout
    count = NOH * ow                       # N*OH*OW samples per channel
    inv_count = 1.0 / count

    # ---- Convolution: ONE lane-dense MXU matmul (bf16 operands, f32 accum) ----
    acc = jnp.dot(lhs_ref[...], w_ref[...], preferred_element_type=jnp.float32)

    # ---- BatchNorm2d training-mode batch stats (two-pass, pure f32) ----------
    # Sublane reduce over rows, then a roll-and-add tree over the OW lane groups:
    # after log2(OW) steps every lane holds the total sum for its channel,
    # already replicated per lane group (no fold/spread matmuls, MXU untouched).
    # Requires OW to be a power of two (asserted in the wrapper).
    def group_allsum(row):                 # (1, OWC) -> (1, OWC)
        shift = cout
        while shift < OWC:
            row = row + pltpu.roll(row, shift=shift, axis=1)
            shift *= 2
        return row

    row_sum = jnp.sum(acc, axis=0, keepdims=True)                    # (1, OWC)
    mean = group_allsum(row_sum) * inv_count                          # per-channel
    centered = acc - mean
    sq_sum = jnp.sum(centered * centered, axis=0, keepdims=True)      # (1, OWC)
    var = group_allsum(sq_sum) * inv_count                            # biased var
    inv_std = jax.lax.rsqrt(var + BN_EPS)                             # EUP, f32

    y = centered * (inv_std * gamma_ref[...]) + beta_ref[...]

    # ---- ReLU + lane-dense store (last dim multiple of 128 -> unmasked vst) --
    o_ref[...] = jnp.maximum(y, 0.0)


@functools.partial(jax.jit, static_argnames=("padding",))
def conv_bn_relu(x_nchw, weight_oihw, gamma, beta, padding):
    """x_nchw: (N, Cin, H, W); weight_oihw: (Cout, Cin, KH, KW). Returns NCHW f32."""
    N, Cin, H, W = x_nchw.shape
    Cout, _, KH, KW = weight_oihw.shape
    OH = H + 2 * padding - KH + 1
    OW = W + 2 * padding - KW + 1
    assert (OW & (OW - 1)) == 0, "roll-tree BN reduction assumes power-of-two OW"
    # TODO(synk): for non-power-of-two OW fall back to a single precomputed
    # (OW*Cout, OW*Cout) 0/1 bf16 "fold+spread" matmul for the channel stats.

    # --- Activations: NCHW -> bf16 -> H-pad -> im2row over H.
    #     LHS[n*OH+oh, kh*W*Cin + w*Cin + ci] = x_pad[n, oh+kh, w, ci]
    x_hwc = jnp.transpose(x_nchw, (0, 2, 3, 1)).astype(jnp.bfloat16)     # (N,H,W,Cin)
    x_pad = jnp.pad(x_hwc, ((0, 0), (padding, padding), (0, 0), (0, 0)))
    taps = jnp.stack([x_pad[:, kh:kh + OH] for kh in range(KH)], axis=2)  # (N,OH,KH,W,Cin)
    kfull = KH * W * Cin
    kpad = ((kfull + 255) // 256) * 256        # 256-deep MXU / 128-lane multiple
    lhs = taps.reshape(N * OH, kfull)
    lhs = jnp.pad(lhs, ((0, 0), (0, kpad - kfull)))                       # (N*OH, Kpad)

    # --- Weight: block-Toeplitz over W, reshaped to (Kpad, OW*Cout), bf16.
    #     T[kh, w*Cin+ci, ow*Cout+co] = weight[co, ci, kh, kw] with kw = w+pad-ow
    #     (zero when no valid tap -> implements W zero-padding for free).
    w_hwio = jnp.transpose(weight_oihw, (2, 3, 1, 0)).astype(jnp.float32)
    w_idx = jnp.arange(W)
    ow_idx = jnp.arange(OW)
    kw_idx = jnp.arange(KW)
    mask = (w_idx[None, :, None] + padding
            == ow_idx[None, None, :] + kw_idx[:, None, None]).astype(jnp.float32)  # (KW,W,OW)
    toep = (mask[None, :, :, None, :, None]
            * w_hwio[:, :, None, :, None, :]).sum(axis=1)                # (KH,W,Cin,OW,Cout)
    wmat = toep.reshape(kfull, OW * Cout).astype(jnp.bfloat16)
    wmat = jnp.pad(wmat, ((0, kpad - kfull), (0, 0)))                    # (Kpad, OW*Cout)

    # --- BN affine params pre-tiled to the lane-dense layout (ow-major, ch-minor).
    gamma_t = jnp.tile(gamma.astype(jnp.float32), OW).reshape(1, OW * Cout)
    beta_t = jnp.tile(beta.astype(jnp.float32), OW).reshape(1, OW * Cout)

    flops = 2 * (N * OH) * kpad * (OW * Cout) + 6 * (N * OH) * (OW * Cout)
    bytes_accessed = (lhs.size * 2 + wmat.size * 2
                      + (gamma_t.size + beta_t.size) * 4
                      + N * OH * OW * Cout * 4)

    vmem_spec = pl.BlockSpec(memory_space=pltpu.MemorySpace.VMEM)
    out2d = pl.pallas_call(
        functools.partial(conv_bn_relu_kernel, cout=Cout),
        out_shape=jax.ShapeDtypeStruct((N * OH, OW * Cout), jnp.float32),
        in_specs=[vmem_spec] * 4,
        out_specs=vmem_spec,
        cost_estimate=pl.CostEstimate(flops=flops, transcendentals=OW * Cout,
                                      bytes_accessed=bytes_accessed),
    )(lhs, wmat, gamma_t, beta_t)

    # Un-fold the lane-dense layout back to PyTorch NCHW.
    return jnp.transpose(out2d.reshape(N, OH, OW, Cout), (0, 3, 1, 2))


def reference(x_nchw, weight_oihw, gamma, beta, padding):
    """Pure-JAX f32 reference (conv + training-mode BN + relu) for validation."""
    y = jax.lax.conv_general_dilated(
        x_nchw.astype(jnp.float32), weight_oihw.astype(jnp.float32),
        window_strides=(1, 1), padding=[(padding, padding)] * 2,
        dimension_numbers=("NCHW", "OIHW", "NCHW"),
        precision=jax.lax.Precision.HIGHEST)
    mean = jnp.mean(y, axis=(0, 2, 3), keepdims=True)
    var = jnp.var(y, axis=(0, 2, 3), keepdims=True)   # biased, as in BN training
    yn = (y - mean) * jax.lax.rsqrt(var + BN_EPS)
    yn = yn * gamma.reshape(1, -1, 1, 1) + beta.reshape(1, -1, 1, 1)
    return jnp.maximum(yn, 0.0)


if __name__ == "__main__":
    # Shapes consistent with the module: ConvBNReLU(4, 8, kernel_size=3, padding=1)
    N, Cin, H, W = 2, 4, 16, 16
    Cout, K, padding = 8, 3, 1

    key = jax.random.PRNGKey(0)
    kx, kw, kg, kb = jax.random.split(key, 4)
    x = jax.random.normal(kx, (N, Cin, H, W), dtype=jnp.float32)
    fan_in = Cin * K * K
    weight = jax.random.uniform(kw, (Cout, Cin, K, K), dtype=jnp.float32,
                                minval=-1.0, maxval=1.0) / np.sqrt(fan_in)
    gamma = 1.0 + 0.1 * jax.random.normal(kg, (Cout,), dtype=jnp.float32)
    beta = 0.1 * jax.random.normal(kb, (Cout,), dtype=jnp.float32)

    out = jax.block_until_ready(conv_bn_relu(x, weight, gamma, beta, padding=padding))
    ref = jax.block_until_ready(reference(x, weight, gamma, beta, padding))

    # Tolerance accommodates bf16 MXU operands in the kernel vs. the pure-f32
    # reference (conv/BN/ReLU logic errors would show up as O(0.1-1) deviations).
    np.testing.assert_allclose(np.asarray(out), np.asarray(ref), atol=2e-2, rtol=2e-2)

    print("KERNEL_OK")
</pallas_src>

<mosaic_0001>
module attributes {stable_mosaic.version = 11 : i64} {
  func.func @conv_bn_relu_kernel(%arg0: memref<32x256xbf16, #tpu.memory_space<vmem>>, %arg1: memref<256x128xbf16, #tpu.memory_space<vmem>>, %arg2: memref<1x128xf32, #tpu.memory_space<vmem>>, %arg3: memref<1x128xf32, #tpu.memory_space<vmem>>, %arg4: memref<32x128xf32, #tpu.memory_space<vmem>>) attributes {dimension_semantics = [], scalar_prefetch = 0 : i64, scratch_operands = 0 : i64, tpu.core_type = #tpu.core_type<tc>} {
    %c0 = arith.constant 0 : index
    %c0_0 = arith.constant 0 : index
    %0 = vector.load %arg0[%c0, %c0_0] : memref<32x256xbf16, #tpu.memory_space<vmem>>, vector<32x256xbf16>
    %c0_1 = arith.constant 0 : index
    %c0_2 = arith.constant 0 : index
    %1 = vector.load %arg1[%c0_1, %c0_2] : memref<256x128xbf16, #tpu.memory_space<vmem>>, vector<256x128xbf16>
    %cst = arith.constant dense<0.000000e+00> : vector<32x128xf32>
    %2 = tpu.matmul %0, %1, %cst {dimension_numbers = #tpu.dot_dimension_numbers<[1], [0], [0], [1], [0, 0, 1, 1], [], []>} : vector<32x256xbf16>, vector<256x128xbf16>, vector<32x128xf32> -> vector<32x128xf32>
    %cst_3 = arith.constant dense<0.000000e+00> : vector<128xf32>
    %3 = vector.multi_reduction <add>, %2, %cst_3 [0] : vector<32x128xf32> to vector<128xf32>
    %4 = vector.shape_cast %3 : vector<128xf32> to vector<1x128xf32>
    %c8_i32 = arith.constant 8 : i32
    %5 = tpu.dynamic_rotate %4 by %c8_i32 dim 1 : vector<1x128xf32>, i32 -> vector<1x128xf32>
    %6 = arith.addf %4, %5 : vector<1x128xf32>
    %c16_i32 = arith.constant 16 : i32
    %7 = tpu.dynamic_rotate %6 by %c16_i32 dim 1 : vector<1x128xf32>, i32 -> vector<1x128xf32>
    %8 = arith.addf %6, %7 : vector<1x128xf32>
    %c32_i32 = arith.constant 32 : i32
    %9 = tpu.dynamic_rotate %8 by %c32_i32 dim 1 : vector<1x128xf32>, i32 -> vector<1x128xf32>
    %10 = arith.addf %8, %9 : vector<1x128xf32>
    %c64_i32 = arith.constant 64 : i32
    %11 = tpu.dynamic_rotate %10 by %c64_i32 dim 1 : vector<1x128xf32>, i32 -> vector<1x128xf32>
    %12 = arith.addf %10, %11 : vector<1x128xf32>
    %cst_4 = arith.constant 0.001953125 : f32
    %13 = vector.broadcast %cst_4 : f32 to vector<1x128xf32>
    %14 = arith.mulf %12, %13 : vector<1x128xf32>
    %15 = vector.broadcast %14 : vector<1x128xf32> to vector<32x128xf32>
    %16 = arith.subf %2, %15 : vector<32x128xf32>
    %17 = arith.mulf %16, %16 : vector<32x128xf32>
    %cst_5 = arith.constant dense<0.000000e+00> : vector<128xf32>
    %18 = vector.multi_reduction <add>, %17, %cst_5 [0] : vector<32x128xf32> to vector<128xf32>
    %19 = vector.shape_cast %18 : vector<128xf32> to vector<1x128xf32>
    %c8_i32_6 = arith.constant 8 : i32
    %20 = tpu.dynamic_rotate %19 by %c8_i32_6 dim 1 : vector<1x128xf32>, i32 -> vector<1x128xf32>
    %21 = arith.addf %19, %20 : vector<1x128xf32>
    %c16_i32_7 = arith.constant 16 : i32
    %22 = tpu.dynamic_rotate %21 by %c16_i32_7 dim 1 : vector<1x128xf32>, i32 -> vector<1x128xf32>
    %23 = arith.addf %21, %22 : vector<1x128xf32>
    %c32_i32_8 = arith.constant 32 : i32
    %24 = tpu.dynamic_rotate %23 by %c32_i32_8 dim 1 : vector<1x128xf32>, i32 -> vector<1x128xf32>
    %25 = arith.addf %23, %24 : vector<1x128xf32>
    %c64_i32_9 = arith.constant 64 : i32
    %26 = tpu.dynamic_rotate %25 by %c64_i32_9 dim 1 : vector<1x128xf32>, i32 -> vector<1x128xf32>
    %27 = arith.addf %25, %26 : vector<1x128xf32>
    %cst_10 = arith.constant 0.001953125 : f32
    %28 = vector.broadcast %cst_10 : f32 to vector<1x128xf32>
    %29 = arith.mulf %27, %28 : vector<1x128xf32>
    %cst_11 = arith.constant 9.99999974E-6 : f32
    %30 = vector.broadcast %cst_11 : f32 to vector<1x128xf32>
    %31 = arith.addf %29, %30 : vector<1x128xf32>
    %32 = math.rsqrt %31 : vector<1x128xf32>
    %c0_12 = arith.constant 0 : index
    %c0_13 = arith.constant 0 : index
    %33 = vector.load %arg2[%c0_12, %c0_13] : memref<1x128xf32, #tpu.memory_space<vmem>>, vector<1x128xf32>
    %34 = arith.mulf %32, %33 : vector<1x128xf32>
    %35 = vector.broadcast %34 : vector<1x128xf32> to vector<32x128xf32>
    %36 = arith.mulf %16, %35 : vector<32x128xf32>
    %c0_14 = arith.constant 0 : index
    %c0_15 = arith.constant 0 : index
    %37 = vector.load %arg3[%c0_14, %c0_15] : memref<1x128xf32, #tpu.memory_space<vmem>>, vector<1x128xf32>
    %38 = vector.broadcast %37 : vector<1x128xf32> to vector<32x128xf32>
    %39 = arith.addf %36, %38 : vector<32x128xf32>
    %cst_16 = arith.constant 0.000000e+00 : f32
    %40 = vector.broadcast %cst_16 : f32 to vector<32x128xf32>
    %41 = arith.maximumf %39, %40 : vector<32x128xf32>
    %c0_17 = arith.constant 0 : index
    %c0_18 = arith.constant 0 : index
    %42 = vector.load %arg4[%c0_17, %c0_18] : memref<32x128xf32, #tpu.memory_space<vmem>>, vector<32x128xf32>
    tpu.vector_store %arg4[%c0_17, %c0_18], %41 {strides = array<i32>} : memref<32x128xf32, #tpu.memory_space<vmem>>, vector<32x128xf32>,
    return
  }
}

</mosaic_0001>

<bundles_post_ra>
// kernel: tile.13
= control target key start
LH: loop header
LB: loop body
LE: loop exit
PB: predicated region body
PF: predicated region fallthrough
CT: control target
= control target key end

     0   :  { %s28_s0 = inlined_call_operand.vmem [shape: f32[8], index: 0, kind: input, shape index: {}]   ;;  %s29_s1 = inlined_call_operand.vmem [shape: f32[16,8], index: 1, kind: output, shape index: {}]  }
   0x1   :  { %v4_v0 = vld [vmem:[%s28_s0] ss:$0 sm:$0xff] }
   0x2   :  { %5 = vst [vmem:[%s29_s1] sm:$0xff] %v4_v0  ;;  %8 = vst [vmem:[%s29_s1 + $0x8] sm:$0xff] %v4_v0 }

// kernel: tile.14
= control target key start
LH: loop header
LB: loop body
LE: loop exit
PB: predicated region body
PF: predicated region fallthrough
CT: control target
= control target key end

     0   :  { %s133_s10 = smov 120   ;;  %s134_s11 = smov 104   ;;  %vm3_vm0 = vcmask 64512   ;;  %vm9_vm1 = vcmask 1048512   ;;  %vm15_vm2 = vcmask 982912   ;;  %vm21_vm3 = vcmask 917312   ;;  %s209_s0 = inlined_call_operand.vmem [shape: f32[16,8], index: 0, kind: input, shape index: {}]   ;;  %s210_s1 = inlined_call_operand.vmem [shape: f32[1,128], index: 1, kind: output, shape index: {}]  }
   0x1   :  { %v103_v0 = vld [vmem:[%s209_s0 + $0xf] sm:$0x1]   ;;  %v105_v1 = vld [vmem:[%s209_s0 + $0xd] sm:$0x1]   ;;  %v104_v2 = vld [vmem:[%s209_s0 + $0xe] sm:$0x1]  }
   0x2   :  { %7 = vrot.lane.b32.xlu0 %v103_v0, %s133_s10  ;;  %19 = vrot.lane.b32.xlu1 %v105_v1, %s134_s11  ;;  %v106_v3 = vld [vmem:[%s209_s0 + $0xc] sm:$0x1]   ;;  %s135_s16 = smov 112   ;;  %s136_s17 = smov 96   ;;  %v107_v4 = vld [vmem:[%s209_s0 + $0xb] sm:$0x1]  }
   0x3   :  { %v108_v5 = vld [vmem:[%s209_s0 + $0xa] sm:$0x1]   ;;  %v2_v6 = vld [vmem:[%s209_s0] sm:$0x1]   ;;  %s137_s24 = smov 88   ;;  %s138_s25 = smov 80  }
   0x4   :  { %4 = vst.msk [vmem:[#allocation0] sm:$0x1] %vm3_vm0, %v2_v6   ;;  %v109_v7 = vld [vmem:[%s209_s0 + $0x9] sm:$0x1]   ;;  %v110_v8 = vld [vmem:[%s209_s0 + $0x8] sm:$0x1]  }
   0x5   :  { %s139_s30 = smov 72   ;;  %s140_s2 = smov 64   ;;  %v111_v9 = vld [vmem:[%s209_s0 + $0x7] sm:$0x1]   ;;  %v112_v10 = vld [vmem:[%s209_s0 + $0x6] sm:$0x1]  }
   0x6   :  { %13 = vrot.lane.b32.xlu0 %v104_v2, %s135_s16  ;;  %25 = vrot.lane.b32.xlu1 %v106_v3, %s136_s17  ;;  %s141_s7 = smov 56   ;;  %s142_s8 = smov 48   ;;  %v113_v11 = vld [vmem:[%s209_s0 + $0x5] sm:$0x1]   ;;  %v114_v12 = vld [vmem:[%s209_s0 + $0x4] sm:$0x1]  }
   0x7   :  { %s143_s13 = smov 40   ;;  %s144_s14 = smov 32   ;;  %v115_v13 = vld [vmem:[%s209_s0 + $0x3] sm:$0x1]   ;;  %v116_v14 = vld [vmem:[%s209_s0 + $0x2] sm:$0x1]  }
   0x8   :  { %s145_s19 = smov 24   ;;  %s146_s20 = smov 16   ;;  %v117_v15 = vld [vmem:[%s209_s0 + $0x1] sm:$0x1]   ;;  %vm27_vm4 = vcmask 851712   ;;  %vm33_vm5 = vcmask 786112  }
   0x9   :  { %s147_s0 = smov 8   ;;  %vm39_vm6 = vcmask 720512   ;;  %vm45_vm7 = vcmask 654912   ;;  %vm51_vm8 = vcmask 589312   ;;  %vm57_vm9 = vcmask 523712  }
   0xa   :  { %31 = vrot.lane.b32.xlu0 %v107_v4, %s137_s24  ;;  %37 = vrot.lane.b32.xlu1 %v108_v5, %s138_s25  ;;  %vm63_vm10 = vcmask 458112   ;;  %vm69_vm11 = vcmask 392512   ;;  %vm75_vm12 = vcmask 326912   ;;  %vm81_vm13 = vcmask 261312  }
   0xb   :  { %vm87_vm14 = vcmask 195712   ;;  %vm93_vm15 = vcmask 130112  }
   0xe   :  { %43 = vrot.lane.b32.xlu0 %v109_v7, %s139_s30  ;;  %49 = vrot.lane.b32.xlu1 %v110_v8, %s140_s2 }
  0x12   :  { %55 = vrot.lane.b32.xlu0 %v111_v9, %s141_s7  ;;  %61 = vrot.lane.b32.xlu1 %v112_v10, %s142_s8 }
  0x16   :  { %67 = vrot.lane.b32.xlu0 %v113_v11, %s143_s13  ;;  %73 = vrot.lane.b32.xlu1 %v114_v12, %s144_s14 }
  0x1a   :  { %79 = vrot.lane.b32.xlu0 %v115_v13, %s145_s19  ;;  %85 = vrot.lane.b32.xlu1 %v116_v14, %s146_s20 }
  0x1e   :  { %91 = vrot.lane.b32.xlu0 %v117_v15, %s147_s0 }
  0x74   :  { %v8_v16 = vpop.permute.xlu0 %7   ;;  %v20_v17 = vpop.permute.xlu1 %19  }
  0x75   :  { %10 = vst.msk [vmem:[#allocation0] sm:$0x1] %vm9_vm1, %v8_v16  }
  0x78   :  { %v14_v18 = vpop.permute.xlu0 %13   ;;  %v26_v19 = vpop.permute.xlu1 %25  }
  0x79   :  { %16 = vst.msk [vmem:[#allocation0] sm:$0x1] %vm15_vm2, %v14_v18  }
  0x7a   :  { %22 = vst.msk [vmem:[#allocation0] sm:$0x1] %vm21_vm3, %v20_v17  }
  0x7b   :  { %28 = vst.msk [vmem:[#allocation0] sm:$0x1] %vm27_vm4, %v26_v19  }
  0x7c   :  { %v32_v20 = vpop.permute.xlu0 %31   ;;  %v38_v21 = vpop.permute.xlu1 %37  }
  0x7d   :  { %34 = vst.msk [vmem:[#allocation0] sm:$0x1] %vm33_vm5, %v32_v20  }
  0x7e   :  { %40 = vst.msk [vmem:[#allocation0] sm:$0x1] %vm39_vm6, %v38_v21  }
  0x80   :  { %v44_v22 = vpop.permute.xlu0 %43   ;;  %v50_v23 = vpop.permute.xlu1 %49  }
  0x81   :  { %46 = vst.msk [vmem:[#allocation0] sm:$0x1] %vm45_vm7, %v44_v22  }
  0x82   :  { %52 = vst.msk [vmem:[#allocation0] sm:$0x1] %vm51_vm8, %v50_v23  }
  0x84   :  { %v56_v24 = vpop.permute.xlu0 %55   ;;  %v62_v25 = vpop.permute.xlu1 %61  }
  0x85   :  { %58 = vst.msk [vmem:[#allocation0] sm:$0x1] %vm57_vm9, %v56_v24  }
  0x86   :  { %64 = vst.msk [vmem:[#allocation0] sm:$0x1] %vm63_vm10, %v62_v25  }
  0x88   :  { %v68_v26 = vpop.permute.xlu0 %67   ;;  %v74_v27 = vpop.permute.xlu1 %73  }
  0x89   :  { %70 = vst.msk [vmem:[#allocation0] sm:$0x1] %vm69_vm11, %v68_v26  }
  0x8a   :  { %76 = vst.msk [vmem:[#allocation0] sm:$0x1] %vm75_vm12, %v74_v27  }
  0x8c   :  { %v80_v28 = vpop.permute.xlu0 %79   ;;  %v86_v29 = vpop.permute.xlu1 %85  }
  0x8d   :  { %82 = vst.msk [vmem:[#allocation0] sm:$0x1] %vm81_vm13, %v80_v28  }
  0x8e   :  { %88 = vst.msk [vmem:[#allocation0] sm:$0x1] %vm87_vm14, %v86_v29  }
  0x90   :  { %v92_v30 = vpop.permute.xlu0 %91  }
  0x91   :  { %94 = vst.msk [vmem:[#allocation0] sm:$0x1] %vm93_vm15, %v92_v30  }
  0x98   :  { %v99_v31 = vld [vmem:[#allocation0] sm:$0x1] }
  0x99   :  { %102 = vst [vmem:[%s210_s1] sm:$0x1] %v99_v31 }

// kernel: conv_bn_relu.1
= control target key start
LH: loop header
LB: loop body
LE: loop exit
PB: predicated region body
PF: predicated region fallthrough
CT: control target
= control target key end

     0   :  { %s405_s29 = smov 32   ;;  %s406_s30 = smov 64   ;;  %v241_v47 = vlaneseq  ;;  %s518_s1 = inlined_call_operand.vmem [shape: bf16[256,128], index: 1, kind: input, shape index: {}]   ;;  %s519_s0 = inlined_call_operand.vmem [shape: bf16[32,256], index: 0, kind: input, shape index: {}]   ;;  %s520_s2 = inlined_call_operand.vmem [shape: f32[1,128], index: 2, kind: input, shape index: {}]   ;;  %s521_s3 = inlined_call_operand.vmem [shape: f32[1,128], index: 3, kind: input, shape index: {}]   ;;  %s522_s4 = inlined_call_operand.vmem [shape: f32[32,128], index: 4, kind: output, shape index: {}]  }
   0x1   :  { %v379_v0 = vld [vmem:[%s518_s1 + $0x78] sm:$0xff]   ;;  %v381_v2 = vld [vmem:[%s518_s1 + $0x70] sm:$0xff]   ;;  %v383_v4 = vld [vmem:[%s518_s1 + $0x68] sm:$0xff]  }
   0x2   :  { %v380_v1 = vld [vmem:[%s518_s1 + $0x38] sm:$0xff]   ;;  %331 = vmatprep.subr.bf16.mxu0 %v379_v0  ;;  %359 = vmatprep.subr.bf16.mxu1 %v379_v0  ;;  %v382_v3 = vld [vmem:[%s518_s1 + $0x30] sm:$0xff]   ;;  %v384_v5 = vld [vmem:[%s518_s1 + $0x28] sm:$0xff]   ;;  %v242_v48 = vshrl.u32 %v241_v47, 7 }
   0x3   :  { %332 = vmatpush3.bf16.msra.mxu0 %v380_v1  ;;  %367 = vmatpush3.bf16.msra.mxu1 %v380_v1  ;;  %v385_v6 = vld [vmem:[%s518_s1 + $0x60] sm:$0xff]   ;;  %v387_v8 = vld [vmem:[%s518_s1 + $0x58] sm:$0xff]   ;;  %v389_v10 = vld [vmem:[%s518_s1 + $0x50] sm:$0xff]  }
   0x4   :  { %333 = vmatprep.subr.bf16.mxu0 %v381_v2  ;;  %360 = vmatprep.subr.bf16.mxu1 %v381_v2  ;;  %v386_v7 = vld [vmem:[%s518_s1 + $0x20] sm:$0xff]   ;;  %v388_v9 = vld [vmem:[%s518_s1 + $0x18] sm:$0xff]   ;;  %v390_v13 = vld [vmem:[%s518_s1 + $0x10] sm:$0xff]   ;;  %v243_v50 = vsub.s32 0, %v242_v48 }
   0x5   :  { %v397_v11 = vld [vmem:[%s519_s0 + $0x4] ss:$8 sps:$4 sm:$0xff]   ;;  %v400_v12 = vld [vmem:[%s519_s0 + $0x14] ss:$8 sps:$4 sm:$0xff]   ;;  %v395_v18 = vld [vmem:[%s519_s0] ss:$8 sps:$4 sm:$0xff]  }
   0x6   :  { %v391_v14 = vld [vmem:[%s518_s1 + $0x48] sm:$0xff]   ;;  %202 = vmatprep.mubr.bf16.mxu0 %v397_v11  ;;  %210 = vmatprep.mubr.bf16.mxu1 %v400_v12  ;;  %v393_v16 = vld [vmem:[%s518_s1 + $0x40] sm:$0xff]   ;;  %v398_v19 = vld [vmem:[%s519_s0 + $0x10] ss:$8 sps:$4 sm:$0xff]   ;;  %s403_s0 = smov 8  }
   0x7   :  { %334 = vmatpush3.bf16.msra.mxu0 %v382_v3  ;;  %368 = vmatpush3.bf16.msra.mxu1 %v382_v3  ;;  %v392_v15 = vld [vmem:[%s518_s1 + $0x8] sm:$0xff]   ;;  %v394_v17 = vld [vmem:[%s518_s1] sm:$0xff]   ;;  %s404_s1 = smov 16  }
   0x8   :  { %335 = vmatprep.subr.bf16.mxu0 %v383_v4  ;;  %361 = vmatprep.subr.bf16.mxu1 %v383_v4 }
   0xb   :  { %336 = vmatpush3.bf16.msra.mxu0 %v384_v5  ;;  %369 = vmatpush3.bf16.msra.mxu1 %v384_v5 }
   0xc   :  { %337 = vmatprep.subr.bf16.mxu0 %v385_v6  ;;  %362 = vmatprep.subr.bf16.mxu1 %v385_v6 }
   0xf   :  { %338 = vmatpush3.bf16.msra.mxu0 %v386_v7  ;;  %370 = vmatpush3.bf16.msra.mxu1 %v386_v7 }
  0x10   :  { %339 = vmatprep.subr.bf16.mxu0 %v387_v8  ;;  %363 = vmatprep.subr.bf16.mxu1 %v387_v8 }
  0x13   :  { %340 = vmatpush3.bf16.msra.mxu0 %v388_v9  ;;  %371 = vmatpush3.bf16.msra.mxu1 %v388_v9 }
  0x14   :  { %341 = vmatprep.subr.bf16.mxu0 %v389_v10  ;;  %364 = vmatprep.subr.bf16.mxu1 %v389_v10 }
  0x17   :  { %342 = vmatpush3.bf16.msra.mxu0 %v390_v13  ;;  %372 = vmatpush3.bf16.msra.mxu1 %v390_v13 }
  0x18   :  { %343 = vmatprep.subr.bf16.mxu0 %v391_v14  ;;  %365 = vmatprep.subr.bf16.mxu1 %v391_v14 }
  0x1b   :  { %344 = vmatpush3.bf16.msra.mxu0 %v392_v15  ;;  %373 = vmatpush3.bf16.msra.mxu1 %v392_v15 }
  0x1c   :  { %345 = vmatprep.subr.bf16.mxu0 %v393_v16  ;;  %366 = vmatprep.subr.bf16.mxu1 %v393_v16 }
  0x1f   :  { %346 = vmatpush3.bf16.msra.mxu0 %v394_v17  ;;  %374 = vmatpush3.bf16.msra.mxu1 %v394_v17  ;;  %v277_v17 = vld [vmem:[%s520_s2] sm:$0x1] }
  0x22   :  { %203 = vmatmul.mubr.bf16.vlgmr.msra.gmra.mxu0 %v395_v18  ;;  %211 = vmatmul.mubr.bf16.vlgmr.msra.gmra.mxu1 %v398_v19 }
  0xe2   :  { %v347_v20 = vpop.f32.mrf.mxu0  ;;  %v353_v21 = vpop.f32.mrf.mxu1 }
  0xe4   :  { %v348_v22 = vpop.f32.mrf.mxu0  ;;  %v354_v23 = vpop.f32.mrf.mxu1 }
  0xe5   :  { %v349_v27 = vadd.f32 %v348_v22, %v347_v20  ;;  %v355_v30 = vadd.f32 %v354_v23, %v353_v21  ;;  %v330_v21 = vld [vmem:[%s521_s3] ss:$0 sm:$0xff] }
  0xe6   :  { %v350_v24 = vpop.f32.mrf.mxu0  ;;  %v356_v25 = vpop.f32.mrf.mxu1 }
  0xe8   :  { %v351_v26 = vpop.f32.mrf.mxu0  ;;  %v357_v29 = vpop.f32.mrf.mxu1 }
  0xe9   :  { %v352_v28 = vadd.f32 %v351_v26, %v350_v24  ;;  %v358_v32 = vadd.f32 %v357_v29, %v356_v25 }
  0xeb   :  { %v219_v31 = vadd.f32 %v352_v28, %v349_v27 }
  0xed   :  { %v220_v33 = vadd.f32 %v355_v30, %v219_v31 }
  0xef   :  { %v221_v34 = vadd.f32 %v358_v32, %v220_v33 }
  0xf1   :  { %v222_v35 = vrot.slane %v221_v34, 4 }
  0xf3   :  { %v223_v36 = vadd.f32 %v222_v35, %v221_v34 }
  0xf5   :  { %v224_v37 = vrot.slane %v223_v36, 2 }
  0xf7   :  { %v225_v38 = vadd.f32 %v224_v37, %v223_v36 }
  0xf9   :  { %v226_v39 = vrot.slane %v225_v38, 1 }
  0xfb   :  { %v227_v40 = vadd.f32 %v226_v39, %v225_v38 }
  0xfd   :  { %228 = vrot.lane.b32.xlu0 %v227_v40, %s403_s0 }
 0x16f   :  { %v229_v41 = vpop.permute.xlu0 %228 }
 0x170   :  { %v230_v42 = vadd.f32 %v229_v41, %v227_v40 }
 0x172   :  { %231 = vrot.lane.b32.xlu0 %v230_v42, %s404_s1 }
 0x1e4   :  { %v232_v43 = vpop.permute.xlu0 %231 }
 0x1e5   :  { %v233_v44 = vadd.f32 %v232_v43, %v230_v42 }
 0x1e7   :  { %234 = vrot.lane.b32.xlu1 %v233_v44, %s405_s29 }
 0x259   :  { %v235_v45 = vpop.permute.xlu1 %234 }
 0x25a   :  { %v236_v46 = vadd.f32 %v235_v45, %v233_v44 }
 0x25c   :  { %237 = vrot.lane.b32.xlu1 %v236_v46, %s406_s30 }
 0x2ce   :  { %v238_v49 = vpop.permute.xlu1 %237 }
 0x2cf   :  { %v239_v51 = vadd.f32 %v238_v49, %v236_v46 }
 0x2d1   :  { %v240_v52 = vmul.f32 0.001953125, %v239_v51 }
 0x2d3   :  { %v244_v53 = vrot.slane %v240_v52, %v243_v50 }
 0x2d5   :  { %v245_v54 = vsub.f32 %v349_v27, %v244_v53  ;;  %v246_v55 = vsub.f32 %v352_v28, %v244_v53  ;;  %v247_v56 = vsub.f32 %v355_v30, %v244_v53  ;;  %v248_v57 = vsub.f32 %v358_v32, %v244_v53 }
 0x2d7   :  { %v249_v58 = vmul.f32 %v245_v54, %v245_v54  ;;  %v250_v59 = vmul.f32 %v246_v55, %v246_v55  ;;  %v251_v60 = vmul.f32 %v247_v56, %v247_v56  ;;  %v252_v62 = vmul.f32 %v248_v57, %v248_v57 }
 0x2d9   :  { %v253_v61 = vadd.f32 %v250_v59, %v249_v58 }
 0x2db   :  { %v254_v63 = vadd.f32 %v253_v61, %v251_v60 }
 0x2dd   :  { %v255_v0 = vadd.f32 %v254_v63, %v252_v62 }
 0x2df   :  { %v256_v1 = vrot.slane %v255_v0, 4 }
 0x2e1   :  { %v257_v2 = vadd.f32 %v256_v1, %v255_v0 }
 0x2e3   :  { %v258_v3 = vrot.slane %v257_v2, 2 }
 0x2e5   :  { %v259_v4 = vadd.f32 %v258_v3, %v257_v2 }
 0x2e7   :  { %v260_v5 = vrot.slane %v259_v4, 1 }
 0x2e9   :  { %v261_v6 = vadd.f32 %v260_v5, %v259_v4 }
 0x2eb   :  { %262 = vrot.lane.b32.xlu0 %v261_v6, %s403_s0 }
 0x35d   :  { %v263_v7 = vpop.permute.xlu0 %262 }
 0x35e   :  { %v264_v8 = vadd.f32 %v263_v7, %v261_v6 }
 0x360   :  { %265 = vrot.lane.b32.xlu1 %v264_v8, %s404_s1 }
 0x3d2   :  { %v266_v9 = vpop.permute.xlu1 %265 }
 0x3d3   :  { %v267_v10 = vadd.f32 %v266_v9, %v264_v8 }
 0x3d5   :  { %268 = vrot.lane.b32.xlu0 %v267_v10, %s405_s29 }
 0x447   :  { %v269_v11 = vpop.permute.xlu0 %268 }
 0x448   :  { %v270_v12 = vadd.f32 %v269_v11, %v267_v10 }
 0x44a   :  { %271 = vrot.lane.b32.xlu1 %v270_v12, %s406_s30 }
 0x4bc   :  { %v272_v13 = vpop.permute.xlu1 %271 }
 0x4bd   :  { %v273_v14 = vadd.f32 %v272_v13, %v270_v12 }
 0x4bf   :  { %v274_v15 = vmul.f32 0.001953125, %v273_v14 }
 0x4c1   :  { %v275_v16 = vadd.f32 1e-05, %v274_v15 }
 0x4c3   :  { %401 = vrsqrt.f32 %v275_v16 }
 0x4d0   :  { %v402_v18 = vpop.eup %401 }
 0x4d1   :  { %v278_v19 = vmul.f32 %v402_v18, %v277_v17 }
 0x4d3   :  { %v282_v20 = vrot.slane %v278_v19, %v243_v50 }
 0x4d5   :  { %v283_v22 = vmul.f32 %v282_v20, %v245_v54  ;;  %v284_v23 = vmul.f32 %v282_v20, %v246_v55  ;;  %v285_v24 = vmul.f32 %v282_v20, %v247_v56  ;;  %v286_v25 = vmul.f32 %v282_v20, %v248_v57 }
 0x4d7   :  { %v294_v26 = vadd.f32 %v330_v21, %v283_v22  ;;  %v295_v27 = vadd.f32 %v330_v21, %v284_v23  ;;  %v296_v28 = vadd.f32 %v330_v21, %v285_v24  ;;  %v297_v29 = vadd.f32 %v330_v21, %v286_v25 }
 0x4d9   :  { %v298_v30 = vmax.f32 %v294_v26, 0.0  ;;  %v299_v31 = vmax.f32 %v295_v27, 0.0  ;;  %v300_v32 = vmax.f32 %v296_v28, 0.0  ;;  %v301_v33 = vmax.f32 %v297_v29, 0.0 }
 0x4db   :  { %302 = vst [vmem:[%s522_s4] sm:$0xff] %v298_v30  ;;  %303 = vst [vmem:[%s522_s4 + $0x8] sm:$0xff] %v299_v31 }
 0x4dc   :  { %304 = vst [vmem:[%s522_s4 + $0x10] sm:$0xff] %v300_v32  ;;  %305 = vst [vmem:[%s522_s4 + $0x18] sm:$0xff] %v301_v33 }

</bundles_post_ra>
